<compile_context>
chip_gen: v7x
topology: tpu7x:2x2x1
jax: 0.10.0
libtpu: 0.0.40
codegen_flags: <defaults>
</compile_context>

<pallas_src>
import functools

import jax
import jax.numpy as jnp
from jax.experimental import pallas as pl
from jax.experimental.pallas import tpu as pltpu


def _round_up(a, b):
    return (a + b - 1) // b * b


def ensemble_head_kernel(x_ref, w1_ref, b1_ref, w2_ref, b2_ref, o_ref):
    # x_ref:  (tile_p, 128)  -- 4 batch rows packed per sublane row (lane-dense).
    # w1_ref: (128, 128)     -- block-diag(W1^T x4), so K = 128 on the MXU.
    # b1_ref: (1, 128)       -- b1 tiled 4x along lanes.
    # w2_ref: (128, 4)       -- block-diag(w2^T x4).
    # b2_ref: (1, 1) scalar in SMEM.
    h = jnp.dot(x_ref[...], w1_ref[...], preferred_element_type=jnp.float32)
    h = jnp.maximum(h + b1_ref[...], 0.0)
    out = jnp.dot(h, w2_ref[...], preferred_element_type=jnp.float32)
    o_ref[...] = (out + b2_ref[0, 0]).astype(o_ref.dtype)


def _ref_forward(x, w1, b1, w2, b2):
    h = jnp.maximum(jnp.dot(x.astype(jnp.float32), w1.T) + b1, 0.0)
    return jnp.dot(h, w2.T) + b2


@functools.partial(jax.jit, static_argnames=("tile_rows",))
def ensemble_head(x, w1, b1, w2, b2, *, tile_rows=16384):
    """Forward pass of EnsembleHead.

    Args:
      x:  (n, mlp) activations (f32 or bf16).
      w1: (mlp, mlp) first Linear weight, PyTorch layout (out, in).
      b1: (mlp,)    first Linear bias.
      w2: (1, mlp)  second Linear weight, PyTorch layout (out, in).
      b2: (1,)      second Linear bias.
    Returns:
      (n, 1) output, matching nn.Sequential(Linear, ReLU, Linear).
    """
    n, mlp = x.shape
    f32 = jnp.float32
    # Keep the tiny resident weights in f32 regardless of activation dtype.
    w1 = w1.astype(f32)
    b1 = b1.reshape(mlp).astype(f32)
    w2 = w2.reshape(1, mlp).astype(f32)
    b2s = b2.reshape(1, 1).astype(f32)

    # Lane-packing factor: how many batch rows fit in one 128-wide lane group.
    pack = 128 // mlp if (mlp <= 128 and 128 % mlp == 0) else 1
    n_main = (n // pack) * pack
    n_packed = n_main // pack

    if n_packed == 0:
        # Fewer rows than one packed group: just do it in plain JAX.
        return _ref_forward(x, w1, b1, w2, b2s[0]).astype(x.dtype)

    kdim = pack * mlp  # 128 for mlp=32

    # (n, mlp) -> (n/pack, pack*mlp): contiguous reshape, no HBM relayout.
    x_packed = x[:n_main].reshape(n_packed, kdim)

    # Block-diagonal replication of the weights (built once per trace; 64 KiB).
    eye = jnp.eye(pack, dtype=f32)
    w1bd = jnp.kron(eye, w1.T)                     # (kdim, kdim)
    b1rep = jnp.tile(b1, pack).reshape(1, kdim)    # (1, kdim)
    w2bd = jnp.kron(eye, w2.T)                     # (kdim, pack)

    # Tile selection: big tiles to amortize per-step overhead, but >= 2 grid
    # steps on large inputs so both v7x TensorCores run.  Per-step VMEM at the
    # default (16384 rows -> tile_p=4096): 2 MiB x block + 2 MiB (lane-padded)
    # out block, double-buffered ~8 MiB -> fits v5e/v6e/v7x scoped defaults.
    tile_p_cap = max(8, _round_up(max(int(tile_rows), pack) // pack, 8))
    if n_packed <= tile_p_cap:
        tile_p = n_packed
    else:
        tile_p = min(tile_p_cap, _round_up(pl.cdiv(n_packed, 2), 8))
    grid = pl.cdiv(n_packed, tile_p)

    itemsize = x.dtype.itemsize
    cost = pl.CostEstimate(
        flops=2 * n_packed * (kdim * kdim + kdim * pack),
        transcendentals=0,
        bytes_accessed=(
            n_packed * kdim * itemsize            # x stream
            + n_packed * pack * itemsize          # output stream
            + (w1bd.size + b1rep.size + w2bd.size + 1) * 4  # resident weights
        ),
    )

    out_packed = pl.pallas_call(
        ensemble_head_kernel,
        out_shape=jax.ShapeDtypeStruct((n_packed, pack), x.dtype),
        grid_spec=pltpu.PrefetchScalarGridSpec(
            num_scalar_prefetch=0,
            grid=(grid,),
            in_specs=[
                pl.BlockSpec((tile_p, kdim), lambda i: (i, 0)),      # packed x
                pl.BlockSpec((kdim, kdim), lambda i: (0, 0)),        # W1 blockdiag
                pl.BlockSpec((1, kdim), lambda i: (0, 0)),           # b1 replicated
                pl.BlockSpec((kdim, pack), lambda i: (0, 0)),        # W2 blockdiag
                pl.BlockSpec(memory_space=pltpu.MemorySpace.SMEM),   # b2 scalar
            ],
            out_specs=pl.BlockSpec((tile_p, pack), lambda i: (i, 0)),
        ),
        compiler_params=pltpu.CompilerParams(
            dimension_semantics=("parallel",),
        ),
        cost_estimate=cost,
    )(x_packed, w1bd, b1rep, w2bd, b2s)

    out = out_packed.reshape(n_main, 1)

    if n_main != n:
        # Ragged tail (< pack rows): finish in plain JAX, concat (tiny).
        tail = _ref_forward(x[n_main:], w1, b1, w2, b2s[0]).astype(x.dtype)
        out = jnp.concatenate([out, tail], axis=0)
    return out


def init_params(key, mlp_size=32, dtype=jnp.float32):
    """Deterministic init mimicking nn.Linear (uniform(+/- 1/sqrt(fan_in)))."""
    k1, k2, k3, k4 = jax.random.split(key, 4)
    bound = 1.0 / float(jnp.sqrt(jnp.asarray(mlp_size, jnp.float32)))
    # PyTorch layout: weight is (out_features, in_features).
    w1 = jax.random.uniform(k1, (mlp_size, mlp_size), dtype, -bound, bound)
    b1 = jax.random.uniform(k2, (mlp_size,), dtype, -bound, bound)
    w2 = jax.random.uniform(k3, (1, mlp_size), dtype, -bound, bound)
    b2 = jax.random.uniform(k4, (1,), dtype, -bound, bound)
    return w1, b1, w2, b2


if __name__ == "__main__":
    mlp_size = 32
    batch = 16

    key = jax.random.PRNGKey(0)
    kx, kp = jax.random.split(key)
    x = jax.random.normal(kx, (batch, mlp_size), jnp.float32)
    w1, b1, w2, b2 = init_params(kp, mlp_size=mlp_size)

    out = ensemble_head(x, w1, b1, w2, b2)
    out = jax.block_until_ready(out)

    # Reference in plain JAX (full f32 precision): same math as the PyTorch
    # module (x @ W^T + b).
    hp = jax.lax.Precision.HIGHEST
    ref_h = jnp.maximum(jnp.dot(x, w1.T, precision=hp) + b1, 0.0)
    ref = jnp.dot(ref_h, w2.T, precision=hp) + b2

    assert out.shape == (batch, 1)
    assert jnp.allclose(out, ref, atol=1e-5, rtol=1e-5)

    print("KERNEL_OK")
</pallas_src>

<mosaic_0001>
module attributes {stable_mosaic.version = 11 : i64} {
  func.func @ensemble_head_kernel(%arg0: i32, %arg1: memref<4x128xf32, #tpu.memory_space<vmem>>, %arg2: memref<128x128xf32, #tpu.memory_space<vmem>>, %arg3: memref<1x128xf32, #tpu.memory_space<vmem>>, %arg4: memref<128x4xf32, #tpu.memory_space<vmem>>, %arg5: memref<1x1xf32, #tpu.memory_space<smem>>, %arg6: memref<4x4xf32, #tpu.memory_space<vmem>>) attributes {dimension_semantics = [#tpu.dimension_semantics<parallel>], iteration_bounds = array<i64: 1>, scalar_prefetch = 0 : i64, scratch_operands = 0 : i64, tpu.core_type = #tpu.core_type<tc>, window_params = [{transform_indices = @transform_0, window_bounds = array<i64: 4, 128>}, {pipeline_mode = #tpu.pipeline_mode<synchronous>, transform_indices = @transform_1, window_bounds = array<i64: 128, 128>}, {pipeline_mode = #tpu.pipeline_mode<synchronous>, transform_indices = @transform_2, window_bounds = array<i64: 1, 128>}, {pipeline_mode = #tpu.pipeline_mode<synchronous>, transform_indices = @transform_3, window_bounds = array<i64: 128, 4>}, {transform_indices = @transform_4, window_bounds = array<i64: 1, 1>}, {transform_indices = @transform_5, window_bounds = array<i64: 4, 4>}]} {
    %c0 = arith.constant 0 : index
    %c0_0 = arith.constant 0 : index
    %0 = vector.load %arg1[%c0, %c0_0] : memref<4x128xf32, #tpu.memory_space<vmem>>, vector<4x128xf32>
    %c0_1 = arith.constant 0 : index
    %c0_2 = arith.constant 0 : index
    %1 = vector.load %arg2[%c0_1, %c0_2] : memref<128x128xf32, #tpu.memory_space<vmem>>, vector<128x128xf32>
    %cst = arith.constant dense<0.000000e+00> : vector<4x128xf32>
    %2 = tpu.matmul %0, %1, %cst {dimension_numbers = #tpu.dot_dimension_numbers<[1], [0], [0], [1], [0, 0, 1, 1], [], []>} : vector<4x128xf32>, vector<128x128xf32>, vector<4x128xf32> -> vector<4x128xf32>
    %c0_3 = arith.constant 0 : index
    %c0_4 = arith.constant 0 : index
    %3 = vector.load %arg3[%c0_3, %c0_4] : memref<1x128xf32, #tpu.memory_space<vmem>>, vector<1x128xf32>
    %4 = vector.broadcast %3 : vector<1x128xf32> to vector<4x128xf32>
    %5 = arith.addf %2, %4 : vector<4x128xf32>
    %cst_5 = arith.constant 0.000000e+00 : f32
    %6 = vector.broadcast %cst_5 : f32 to vector<4x128xf32>
    %7 = arith.maximumf %5, %6 : vector<4x128xf32>
    %c0_6 = arith.constant 0 : index
    %c0_7 = arith.constant 0 : index
    %8 = vector.load %arg4[%c0_6, %c0_7] : memref<128x4xf32, #tpu.memory_space<vmem>>, vector<128x4xf32>
    %cst_8 = arith.constant dense<0.000000e+00> : vector<4x4xf32>
    %9 = tpu.matmul %7, %8, %cst_8 {dimension_numbers = #tpu.dot_dimension_numbers<[1], [0], [0], [1], [0, 0, 1, 1], [], []>} : vector<4x128xf32>, vector<128x4xf32>, vector<4x4xf32> -> vector<4x4xf32>
    %c0_9 = arith.constant 0 : index
    %c0_10 = arith.constant 0 : index
    %10 = memref.load %arg5[%c0_9, %c0_10] : memref<1x1xf32, #tpu.memory_space<smem>>
    %11 = vector.broadcast %10 : f32 to vector<4x4xf32>
    %12 = arith.addf %9, %11 : vector<4x4xf32>
    %c0_11 = arith.constant 0 : index
    %c0_12 = arith.constant 0 : index
    %13 = vector.load %arg6[%c0_11, %c0_12] : memref<4x4xf32, #tpu.memory_space<vmem>>, vector<4x4xf32>
    tpu.vector_store %arg6[%c0_11, %c0_12], %12 {strides = array<i32>} : memref<4x4xf32, #tpu.memory_space<vmem>>, vector<4x4xf32>,
    return
  }
  func.func @transform_0(%arg0: i32) -> (i32, i32) {
    %c0_i32 = arith.constant 0 : i32
    %c0_i32_0 = arith.constant 0 : i32
    return %arg0, %c0_i32 : i32, i32
  }
  func.func @transform_1(%arg0: i32) -> (i32, i32) {
    %c0_i32 = arith.constant 0 : i32
    %c0_i32_0 = arith.constant 0 : i32
    %c0_i32_1 = arith.constant 0 : i32
    return %c0_i32, %c0_i32_0 : i32, i32
  }
  func.func @transform_2(%arg0: i32) -> (i32, i32) {
    %c0_i32 = arith.constant 0 : i32
    %c0_i32_0 = arith.constant 0 : i32
    %c0_i32_1 = arith.constant 0 : i32
    return %c0_i32, %c0_i32_0 : i32, i32
  }
  func.func @transform_3(%arg0: i32) -> (i32, i32) {
    %c0_i32 = arith.constant 0 : i32
    %c0_i32_0 = arith.constant 0 : i32
    %c0_i32_1 = arith.constant 0 : i32
    return %c0_i32, %c0_i32_0 : i32, i32
  }
  func.func @transform_4(%arg0: i32) -> (i32, i32) {
    %c0_i32 = arith.constant 0 : i32
    %c0_i32_0 = arith.constant 0 : i32
    %c0_i32_1 = arith.constant 0 : i32
    return %c0_i32, %c0_i32_0 : i32, i32
  }
  func.func @transform_5(%arg0: i32) -> (i32, i32) {
    %c0_i32 = arith.constant 0 : i32
    %c0_i32_0 = arith.constant 0 : i32
    return %arg0, %c0_i32 : i32, i32
  }
}

</mosaic_0001>

<bundles_post_ra>
// kernel: tile.9
= control target key start
LH: loop header
LB: loop body
LE: loop exit
PB: predicated region body
PF: predicated region fallthrough
CT: control target
= control target key end

     0   :  { %vm7_vm0 = vcmask 261120   ;;  %s37_s8 = smov 32   ;;  %s38_s9 = smov 64   ;;  %vm13_vm1 = vcmask 1048320   ;;  %vm19_vm2 = vcmask 785920   ;;  %vm25_vm3 = vcmask 523520   ;;  %s55_s0 = inlined_call_operand.vmem [shape: f32[4,32], index: 0, kind: input, shape index: {}]   ;;  %s56_s1 = inlined_call_operand.vmem [shape: f32[1,128], index: 1, kind: output, shape index: {}]  }
   0x1   :  { %v4_v0 = vld [vmem:[%s55_s0] sm:$0xf]  ;;  %s36_s0 = smov 96  }
   0x2   :  { %5 = vst [vmem:[#allocation1] sm:$0xf] %v4_v0 }
   0x9   :  { %v10_v1 = vld [vmem:[#allocation1 + $0x3] sm:$0x1]   ;;  %v22_v2 = vld [vmem:[#allocation1 + $0x1] sm:$0x1]   ;;  %v6_v3 = vld [vmem:[#allocation1] sm:$0x1]  }
   0xa   :  { %11 = vrot.lane.b32.xlu0 %v10_v1, %s36_s0  ;;  %23 = vrot.lane.b32.xlu1 %v22_v2, %s37_s8  ;;  %v16_v4 = vld [vmem:[#allocation1 + $0x2] sm:$0x1]   ;;  %8 = vst.msk [vmem:[#allocation0] sm:$0x1] %vm7_vm0, %v6_v3  }
   0xe   :  { %17 = vrot.lane.b32.xlu0 %v16_v4, %s38_s9 }
  0x7c   :  { %v12_v5 = vpop.permute.xlu0 %11   ;;  %v24_v6 = vpop.permute.xlu1 %23  }
  0x7d   :  { %14 = vst.msk [vmem:[#allocation0] sm:$0x1] %vm13_vm1, %v12_v5  }
  0x80   :  { %v18_v7 = vpop.permute.xlu0 %17  }
  0x81   :  { %20 = vst.msk [vmem:[#allocation0] sm:$0x1] %vm19_vm2, %v18_v7  }
  0x82   :  { %26 = vst.msk [vmem:[#allocation0] sm:$0x1] %vm25_vm3, %v24_v6  }
  0x89   :  { %v30_v8 = vld [vmem:[#allocation0] sm:$0x1] }
  0x8a   :  { %32 = vst [vmem:[%s56_s1] sm:$0x1] %v30_v8 }

// kernel: ensemble_head.1
= control target key start
LH: loop header
LB: loop body
LE: loop exit
PB: predicated region body
PF: predicated region fallthrough
CT: control target
= control target key end

     0   :  { %v366_v0 = vmov 0.0|0.0   ;;  %vm367_vm0 = vmmov 0   ;;  %v368_v4 = vmov 0.0   ;;  %vm204_vm1 = vcmask 27648   ;;  %s523_s1 = inlined_call_operand.vmem [shape: f32[128,128], index: 1, kind: input, shape index: {}]   ;;  %s524_s3 = inlined_call_operand.vmem [shape: f32[128,4], index: 3, kind: input, shape index: {}]   ;;  %s525_s0 = inlined_call_operand.vmem [shape: f32[4,128], index: 0, kind: input, shape index: {}]   ;;  %s526_s2 = inlined_call_operand.vmem [shape: f32[1,128], index: 2, kind: input, shape index: {}]   ;;  %s527_s4 = inlined_call_operand.<no memory space> [shape: f32[1,1], index: 4, kind: input, shape index: {}]   ;;  %s528_s5 = inlined_call_operand.vmem [shape: f32[4,4], index: 5, kind: output, shape index: {}]  }
   0x1   :  { %315 = vmatprep.subr.bf16.mxu0 %v366_v0  ;;  %v22_v1 = vld [vmem:[%s523_s1] sm:$0xff]  ;;  %v23_v2 = vld [vmem:[%s523_s1 + $0x8] sm:$0xff]  ;;  %v24_v3 = vld [vmem:[%s523_s1 + $0x10] sm:$0xff]  ;;  %277 = vmatprep.mubr.msk.f32.mxu0 %vm367_vm0, %v368_v4  ;;  %v133_v56 = vstv %s527_s4 }
   0x2   :  { %v316_v5 = vpack.c.bf16 %v23_v2, %v22_v1  ;;  %v25_v6 = vld [vmem:[%s523_s1 + $0x18] sm:$0xff]  ;;  %339 = vmatprep.subr.bf16.mxu1 %v366_v0  ;;  %312 = vmatprep.mubr.msk.f32.mxu1 %vm367_vm0, %v368_v4  ;;  %v26_v8 = vld [vmem:[%s523_s1 + $0x20] sm:$0xff]  ;;  %v27_v9 = vld [vmem:[%s523_s1 + $0x28] sm:$0xff] }
   0x3   :  { %v319_v7 = vpack.c.bf16 %v25_v6, %v24_v3  ;;  %v116_v10 = vld [vmem:[%s524_s3] sm:$0xff]  ;;  %v117_v11 = vld [vmem:[%s524_s3 + $0x8] sm:$0xff]  ;;  %v118_v12 = vld [vmem:[%s524_s3 + $0x10] sm:$0xff]  ;;  %v322_v14 = vpack.c.bf16 %v27_v9, %v26_v8 }
   0x4   :  { %317 = vmatpush3.bf16.msra.mxu0 %v316_v5  ;;  %v119_v13 = vld [vmem:[%s524_s3 + $0x18] sm:$0xff]  ;;  %v340_v15 = vpack.c.bf16 %v117_v11, %v116_v10  ;;  %v28_v16 = vld [vmem:[%s523_s1 + $0x30] sm:$0xff]  ;;  %v120_v19 = vld [vmem:[%s524_s3 + $0x20] sm:$0xff] }
   0x5   :  { %318 = vmatprep.subr.bf16.mxu0 %v366_v0  ;;  %v29_v17 = vld [vmem:[%s523_s1 + $0x38] sm:$0xff]  ;;  %v343_v18 = vpack.c.bf16 %v119_v13, %v118_v12  ;;  %v121_v20 = vld [vmem:[%s524_s3 + $0x28] sm:$0xff]  ;;  %v30_v22 = vld [vmem:[%s523_s1 + $0x40] sm:$0xff] }
   0x6   :  { %341 = vmatpush3.bf16.msra.mxu1 %v340_v15  ;;  %v325_v21 = vpack.c.bf16 %v29_v17, %v28_v16  ;;  %v31_v23 = vld [vmem:[%s523_s1 + $0x48] sm:$0xff]  ;;  %v346_v24 = vpack.c.bf16 %v121_v20, %v120_v19  ;;  %v122_v25 = vld [vmem:[%s524_s3 + $0x30] sm:$0xff]  ;;  %v123_v26 = vld [vmem:[%s524_s3 + $0x38] sm:$0xff] }
   0x7   :  { %342 = vmatprep.subr.bf16.mxu1 %v366_v0  ;;  %v328_v27 = vpack.c.bf16 %v31_v23, %v30_v22  ;;  %v32_v28 = vld [vmem:[%s523_s1 + $0x50] sm:$0xff]  ;;  %v33_v29 = vld [vmem:[%s523_s1 + $0x58] sm:$0xff]  ;;  %v349_v30 = vpack.c.bf16 %v123_v26, %v122_v25  ;;  %v124_v31 = vld [vmem:[%s524_s3 + $0x40] sm:$0xff] }
   0x8   :  { %320 = vmatpush3.bf16.msra.mxu0 %v319_v7  ;;  %v125_v32 = vld [vmem:[%s524_s3 + $0x48] sm:$0xff]  ;;  %v331_v33 = vpack.c.bf16 %v33_v29, %v32_v28  ;;  %v34_v34 = vld [vmem:[%s523_s1 + $0x60] sm:$0xff]  ;;  %v126_v37 = vld [vmem:[%s524_s3 + $0x50] sm:$0xff] }
   0x9   :  { %321 = vmatprep.subr.bf16.mxu0 %v366_v0  ;;  %v35_v35 = vld [vmem:[%s523_s1 + $0x68] sm:$0xff]  ;;  %v352_v36 = vpack.c.bf16 %v125_v32, %v124_v31  ;;  %v127_v38 = vld [vmem:[%s524_s3 + $0x58] sm:$0xff]  ;;  %v36_v40 = vld [vmem:[%s523_s1 + $0x70] sm:$0xff] }
   0xa   :  { %344 = vmatpush3.bf16.msra.mxu1 %v343_v18  ;;  %v334_v39 = vpack.c.bf16 %v35_v35, %v34_v34  ;;  %v37_v41 = vld [vmem:[%s523_s1 + $0x78] sm:$0xff]  ;;  %v355_v42 = vpack.c.bf16 %v127_v38, %v126_v37  ;;  %v128_v43 = vld [vmem:[%s524_s3 + $0x60] sm:$0xff]  ;;  %v129_v44 = vld [vmem:[%s524_s3 + $0x68] sm:$0xff] }
   0xb   :  { %345 = vmatprep.subr.bf16.mxu1 %v366_v0  ;;  %v337_v45 = vpack.c.bf16 %v37_v41, %v36_v40  ;;  %v358_v46 = vpack.c.bf16 %v129_v44, %v128_v43  ;;  %v21_v47 = vld [vmem:[%s525_s0] sm:$0xf]  ;;  %v130_v48 = vld [vmem:[%s524_s3 + $0x70] sm:$0xff]  ;;  %v131_v49 = vld [vmem:[%s524_s3 + $0x78] sm:$0xff] }
   0xc   :  { %323 = vmatpush3.bf16.msra.mxu0 %v322_v14  ;;  %v361_v50 = vpack.c.bf16 %v131_v49, %v130_v48  ;;  %v210_v51 = vld [vmem:[%s526_s2] ss:$0 sm:$0xff] }
   0xd   :  { %324 = vmatprep.subr.bf16.mxu0 %v366_v0 }
   0xe   :  { %347 = vmatpush3.bf16.msra.mxu1 %v346_v24 }
   0xf   :  { %348 = vmatprep.subr.bf16.mxu1 %v366_v0 }
  0x10   :  { %326 = vmatpush3.bf16.msra.mxu0 %v325_v21 }
  0x11   :  { %327 = vmatprep.subr.bf16.mxu0 %v366_v0 }
  0x12   :  { %350 = vmatpush3.bf16.msra.mxu1 %v349_v30 }
  0x13   :  { %351 = vmatprep.subr.bf16.mxu1 %v366_v0 }
  0x14   :  { %329 = vmatpush3.bf16.msra.mxu0 %v328_v27 }
  0x15   :  { %330 = vmatprep.subr.bf16.mxu0 %v366_v0 }
  0x16   :  { %353 = vmatpush3.bf16.msra.mxu1 %v352_v36 }
  0x17   :  { %354 = vmatprep.subr.bf16.mxu1 %v366_v0 }
  0x18   :  { %332 = vmatpush3.bf16.msra.mxu0 %v331_v33 }
  0x19   :  { %333 = vmatprep.subr.bf16.mxu0 %v366_v0 }
  0x1a   :  { %356 = vmatpush3.bf16.msra.mxu1 %v355_v42 }
  0x1b   :  { %357 = vmatprep.subr.bf16.mxu1 %v366_v0 }
  0x1c   :  { %335 = vmatpush3.bf16.msra.mxu0 %v334_v39 }
  0x1d   :  { %336 = vmatprep.subr.bf16.mxu0 %v366_v0 }
  0x1e   :  { %359 = vmatpush3.bf16.msra.mxu1 %v358_v46 }
  0x1f   :  { %360 = vmatprep.subr.bf16.mxu1 %v366_v0 }
  0x20   :  { %338 = vmatpush3.bf16.msra.mxu0 %v337_v45 }
  0x22   :  { %362 = vmatpush3.bf16.msra.mxu1 %v361_v50 }
  0x23   :  { %278 = vmatmul.mubr.f32.vlgmr.msra.gmra.mrb[0].mxu0 %v21_v47 }
  0xf6   :  { %v111_v52 = vpop.f32.mrb[0].mxu0 }
  0xf7   :  { %v112_v53 = vadd.f32 %v210_v51, %v111_v52  ;;  %v279_v54 = vpop.f32.mrb[1].mxu0 }
  0xf9   :  { %v115_v55 = vmax.f32 %v112_v53, 0.0 }
  0xfb   :  { %313 = vmatmul.mubr.f32.vlgmr.msra.gmra.mrb[0].mxu1 %v115_v55 }
 0x1ce   :  { %v200_v57 = vpop.f32.mrb[0].mxu1 }
 0x1cf   :  { %v201_v58 = vadd.f32 %v200_v57, %v133_v56  ;;  %v314_v59 = vpop.f32.mrb[1].mxu1 }
 0x1d1   :  { %205 = vst.msk [vmem:[%s528_s5] sm:$0xf] %vm204_vm1, %v201_v58 }

</bundles_post_ra>
